<compile_context>
chip_gen: v6e
topology: v6e:2x2x1
jax: 0.10.0
libtpu: 0.0.40
codegen_flags: <defaults>
</compile_context>

<pallas_src>
import jax
import jax.numpy as jnp
from jax.experimental import pallas as pl
from jax.experimental.pallas import tpu as pltpu

_NEG_LARGE = -1e30  # logit value for padded output classes -> exp() underflows to 0


def _round_up(n: int, m: int) -> int:
    return ((n + m - 1) // m) * m


def mlp_kernel(x_ref, w1_ref, b1_ref, w2_ref, b2_ref, o_ref):
    # Cast streamed activations (f32 from HBM) to the MXU input dtype on the VPU.
    x = x_ref[...].astype(w1_ref.dtype)

    # First linear layer: (TB, dim_in) @ (dim_in, dim_hidden), f32 accumulation.
    h = jnp.dot(x, w1_ref[...], preferred_element_type=jnp.float32)
    h = h + b1_ref[...]  # (1, dim_hidden) broadcasts over the batch tile

    # TODO(synk): nn.Dropout() is stochastic in training mode; identity here
    # (eval semantics). Training parity would need pltpu.prng_seed/prng_random_bits.

    # ReLU
    h = jnp.maximum(h, 0.0)

    # Second linear layer (bf16 MXU inputs, f32 accumulation).
    logits = jnp.dot(h.astype(w2_ref.dtype), w2_ref[...],
                     preferred_element_type=jnp.float32)
    logits = logits + b2_ref[...]  # padded classes get -1e30 -> softmax weight 0

    # Numerically stable softmax over the class dimension (dim=1), f32 end-to-end.
    m = jnp.max(logits, axis=1, keepdims=True)
    e = jnp.exp(logits - m)
    denom = jnp.sum(e, axis=1, keepdims=True)
    o_ref[...] = (e * pl.reciprocal(denom, approx=True)).astype(o_ref.dtype)


def prepare_params(w1, b1, w2, b2, *, compute_dtype=jnp.bfloat16):
    """One-time padding + cast of the weights/biases (hoisted out of forward).

    Weights are (in_features, out_features); biases (out,) or (1, out).
    All lane dims are padded to multiples of 128 so both MXU passes and the
    final store are lane-dense. Padded output classes get a -1e30 bias.
    """
    dim_in, dim_hidden = w1.shape
    dim_out = w2.shape[1]
    dim_in_p = _round_up(dim_in, 128)
    dim_hid_p = _round_up(dim_hidden, 128)
    dim_out_p = _round_up(dim_out, 128)

    w1_p = jnp.pad(w1.astype(compute_dtype),
                   ((0, dim_in_p - dim_in), (0, dim_hid_p - dim_hidden)))
    b1_p = jnp.pad(b1.reshape(1, -1).astype(jnp.float32),
                   ((0, 0), (0, dim_hid_p - dim_hidden)))
    w2_p = jnp.pad(w2.astype(compute_dtype),
                   ((0, dim_hid_p - dim_hidden), (0, dim_out_p - dim_out)))
    b2_p = jnp.pad(b2.reshape(1, -1).astype(jnp.float32),
                   ((0, 0), (0, dim_out_p - dim_out)),
                   constant_values=_NEG_LARGE)

    return {"w1": w1_p, "b1": b1_p, "w2": w2_p, "b2": b2_p,
            "dims": (dim_in, dim_hidden, dim_out)}


def mlp_forward(x_nchw, params, *, block_b=1024):
    """x_nchw: (B, C, H, W). params: output of prepare_params().

    Returns softmax probabilities of shape (B, dim_out), float32.
    """
    dim_in, dim_hidden, dim_out = params["dims"]
    w1_p, b1_p, w2_p, b2_p = params["w1"], params["b1"], params["w2"], params["b2"]
    dim_in_p, dim_hid_p = w1_p.shape
    dim_out_p = w2_p.shape[1]

    B = x_nchw.shape[0]
    x2d = x_nchw.reshape(B, -1)            # matches x.view(-1, C*H*W) in PyTorch
    assert x2d.shape[1] == dim_in, "input feature dim does not match weights"

    # Batch tile: multiple of 8 sublanes; cap at half the batch (rounded to 8)
    # so the grid has >=2 steps and v7x's two TensorCores both get work.
    b_p8 = _round_up(B, 8)
    tb = min(block_b, b_p8)
    if b_p8 >= 16:
        tb = min(tb, max(8, ((b_p8 // 2) // 8) * 8))
    b_p = _round_up(B, tb)
    grid = (b_p // tb,)

    # Pad x only where strictly needed (batch remainder / non-128 dim_in);
    # keep the original dtype — the bf16 cast happens inside the kernel.
    pad_rows = b_p - B
    pad_cols = dim_in_p - dim_in
    x_in = x2d if (pad_rows == 0 and pad_cols == 0) else jnp.pad(
        x2d, ((0, pad_rows), (0, pad_cols)))

    # VMEM budget: 2x double-buffered x/out tiles, single-buffered weights,
    # plus in-kernel intermediates (h in f32+bf16, logits in f32), with headroom.
    x_itemsize = jnp.dtype(x_in.dtype).itemsize
    tile_bytes = (2 * tb * dim_in_p * x_itemsize        # x tile, double-buffered
                  + 2 * tb * dim_out_p * 2              # bf16 out tile, double-buffered
                  + tb * dim_hid_p * (4 + 2)            # h (f32) + h cast (bf16)
                  + tb * dim_out_p * 4)                 # logits (f32)
    weight_bytes = (w1_p.nbytes + w2_p.nbytes + b1_p.nbytes + b2_p.nbytes)
    vmem_need = tile_bytes + weight_bytes
    vmem_limit = int(min(64 << 20, max(32 << 20, 2 * vmem_need)))

    out_p = pl.pallas_call(
        mlp_kernel,
        out_shape=jax.ShapeDtypeStruct((b_p, dim_out_p), jnp.bfloat16),
        grid=grid,
        in_specs=[
            # x: batch-tiled, auto double-buffered.
            pl.BlockSpec((tb, dim_in_p), lambda i: (i, 0)),
            # Weights/biases: constant index_map -> VMEM-resident, single-buffered.
            pl.BlockSpec((dim_in_p, dim_hid_p), lambda i: (0, 0),
                         pipeline_mode=pl.Buffered(1)),
            pl.BlockSpec((1, dim_hid_p), lambda i: (0, 0),
                         pipeline_mode=pl.Buffered(1)),
            pl.BlockSpec((dim_hid_p, dim_out_p), lambda i: (0, 0),
                         pipeline_mode=pl.Buffered(1)),
            pl.BlockSpec((1, dim_out_p), lambda i: (0, 0),
                         pipeline_mode=pl.Buffered(1)),
        ],
        out_specs=pl.BlockSpec((tb, dim_out_p), lambda i: (i, 0)),
        compiler_params=pltpu.CompilerParams(
            dimension_semantics=("parallel",),
            vmem_limit_bytes=vmem_limit),
    )(x_in, w1_p, b1_p, w2_p, b2_p)

    # TODO(synk): for very large dim_in where resident w1 would exceed ~1/3 of
    # scoped VMEM (notably on v7x), add a K grid axis marked "arbitrary" with an
    # f32 accumulator scratch instead of keeping full w1 resident.

    return out_p[:B, :dim_out].astype(jnp.float32)


def init_params(key, dim_in, dim_hidden, dim_out):
    """Deterministic init (uniform, roughly matching nn.Linear scale).

    Weights stored as (in_features, out_features) so the kernel does x @ W + b.
    """
    k1, k2, k3, k4 = jax.random.split(key, 4)
    bound1 = 1.0 / jnp.sqrt(dim_in)
    bound2 = 1.0 / jnp.sqrt(dim_hidden)
    w1 = jax.random.uniform(k1, (dim_in, dim_hidden), jnp.float32, -bound1, bound1)
    b1 = jax.random.uniform(k2, (1, dim_hidden), jnp.float32, -bound1, bound1)
    w2 = jax.random.uniform(k3, (dim_hidden, dim_out), jnp.float32, -bound2, bound2)
    b2 = jax.random.uniform(k4, (1, dim_out), jnp.float32, -bound2, bound2)
    return w1, b1, w2, b2


if __name__ == "__main__":
    # Small shapes consistent with the forward: x is NCHW, flattened to
    # (B, C*H*W) = (2, 4*16*16) = (2, 1024).
    B, C, H, W = 2, 4, 16, 16
    dim_in = C * H * W
    dim_hidden = 32
    dim_out = 16

    key = jax.random.PRNGKey(0)
    kx, kp = jax.random.split(key)
    x = jax.random.normal(kx, (B, C, H, W), dtype=jnp.float32)
    w1, b1, w2, b2 = init_params(kp, dim_in, dim_hidden, dim_out)

    # Pad/cast the weights once (hoisted out of the per-call path).
    params = prepare_params(w1, b1, w2, b2)

    out = mlp_forward(x, params)
    out = jax.block_until_ready(out)

    # Pure-JAX f32 reference (eval-mode dropout = identity).
    x2d = x.reshape(B, dim_in)
    h_ref = jnp.maximum(x2d @ w1 + b1, 0.0)
    ref = jax.nn.softmax(h_ref @ w2 + b2, axis=1)

    assert out.shape == (B, dim_out)
    # bf16 MXU inputs, bf16 output store, approx reciprocal -> loosened tolerance.
    assert jnp.allclose(out, ref, atol=2e-2, rtol=2e-2)
    assert jnp.allclose(jnp.sum(out, axis=1), 1.0, atol=1e-2)

    # Exercise a multi-step batch grid (row padding, pipelining, resident weights,
    # >=2 grid steps so both v7x cores would split the batch).
    B2 = 300
    x_big = jax.random.normal(jax.random.PRNGKey(1), (B2, C, H, W), jnp.float32)
    out_big = jax.block_until_ready(mlp_forward(x_big, params, block_b=128))
    x2d_big = x_big.reshape(B2, dim_in)
    ref_big = jax.nn.softmax(jnp.maximum(x2d_big @ w1 + b1, 0.0) @ w2 + b2, axis=1)
    assert out_big.shape == (B2, dim_out)
    assert jnp.allclose(out_big, ref_big, atol=2e-2, rtol=2e-2)

    print("KERNEL_OK")
</pallas_src>

<mosaic_0001>
module attributes {stable_mosaic.version = 11 : i64} {
  func.func @mlp_kernel(%arg0: i32, %arg1: memref<8x1024xf32, #tpu.memory_space<vmem>>, %arg2: memref<1024x128xbf16, #tpu.memory_space<vmem>>, %arg3: memref<1x128xf32, #tpu.memory_space<vmem>>, %arg4: memref<128x128xbf16, #tpu.memory_space<vmem>>, %arg5: memref<1x128xf32, #tpu.memory_space<vmem>>, %arg6: memref<8x128xbf16, #tpu.memory_space<vmem>>) attributes {dimension_semantics = [#tpu.dimension_semantics<parallel>], iteration_bounds = array<i64: 1>, scalar_prefetch = 0 : i64, scratch_operands = 0 : i64, tpu.core_type = #tpu.core_type<tc>, window_params = [{transform_indices = @transform_0, window_bounds = array<i64: 8, 1024>}, {pipeline_mode = #tpu.pipeline_mode<synchronous>, transform_indices = @transform_1, window_bounds = array<i64: 1024, 128>}, {pipeline_mode = #tpu.pipeline_mode<synchronous>, transform_indices = @transform_2, window_bounds = array<i64: 1, 128>}, {pipeline_mode = #tpu.pipeline_mode<synchronous>, transform_indices = @transform_3, window_bounds = array<i64: 128, 128>}, {pipeline_mode = #tpu.pipeline_mode<synchronous>, transform_indices = @transform_4, window_bounds = array<i64: 1, 128>}, {transform_indices = @transform_5, window_bounds = array<i64: 8, 128>}]} {
    %c0 = arith.constant 0 : index
    %c0_0 = arith.constant 0 : index
    %0 = vector.load %arg1[%c0, %c0_0] : memref<8x1024xf32, #tpu.memory_space<vmem>>, vector<8x1024xf32>
    %1 = arith.truncf %0 : vector<8x1024xf32> to vector<8x1024xbf16>
    %c0_1 = arith.constant 0 : index
    %c0_2 = arith.constant 0 : index
    %2 = vector.load %arg2[%c0_1, %c0_2] : memref<1024x128xbf16, #tpu.memory_space<vmem>>, vector<1024x128xbf16>
    %cst = arith.constant dense<0.000000e+00> : vector<8x128xf32>
    %3 = tpu.matmul %1, %2, %cst {dimension_numbers = #tpu.dot_dimension_numbers<[1], [0], [0], [1], [0, 0, 1, 1], [], []>} : vector<8x1024xbf16>, vector<1024x128xbf16>, vector<8x128xf32> -> vector<8x128xf32>
    %c0_3 = arith.constant 0 : index
    %c0_4 = arith.constant 0 : index
    %4 = vector.load %arg3[%c0_3, %c0_4] : memref<1x128xf32, #tpu.memory_space<vmem>>, vector<1x128xf32>
    %5 = vector.broadcast %4 : vector<1x128xf32> to vector<8x128xf32>
    %6 = arith.addf %3, %5 : vector<8x128xf32>
    %cst_5 = arith.constant 0.000000e+00 : f32
    %7 = vector.broadcast %cst_5 : f32 to vector<8x128xf32>
    %8 = arith.maximumf %6, %7 : vector<8x128xf32>
    %9 = arith.truncf %8 : vector<8x128xf32> to vector<8x128xbf16>
    %c0_6 = arith.constant 0 : index
    %c0_7 = arith.constant 0 : index
    %10 = vector.load %arg4[%c0_6, %c0_7] : memref<128x128xbf16, #tpu.memory_space<vmem>>, vector<128x128xbf16>
    %cst_8 = arith.constant dense<0.000000e+00> : vector<8x128xf32>
    %11 = tpu.matmul %9, %10, %cst_8 {dimension_numbers = #tpu.dot_dimension_numbers<[1], [0], [0], [1], [0, 0, 1, 1], [], []>} : vector<8x128xbf16>, vector<128x128xbf16>, vector<8x128xf32> -> vector<8x128xf32>
    %c0_9 = arith.constant 0 : index
    %c0_10 = arith.constant 0 : index
    %12 = vector.load %arg5[%c0_9, %c0_10] : memref<1x128xf32, #tpu.memory_space<vmem>>, vector<1x128xf32>
    %13 = vector.broadcast %12 : vector<1x128xf32> to vector<8x128xf32>
    %14 = arith.addf %11, %13 : vector<8x128xf32>
    %cst_11 = arith.constant dense<0xFF800000> : vector<8xf32>
    %15 = vector.multi_reduction <maximumf>, %14, %cst_11 [1] : vector<8x128xf32> to vector<8xf32>
    %16 = vector.shape_cast %15 : vector<8xf32> to vector<8x1xf32>
    %17 = vector.broadcast %16 : vector<8x1xf32> to vector<8x128xf32>
    %18 = arith.subf %14, %17 : vector<8x128xf32>
    %19 = math.exp %18 : vector<8x128xf32>
    %cst_12 = arith.constant dense<0.000000e+00> : vector<8xf32>
    %20 = vector.multi_reduction <add>, %19, %cst_12 [1] : vector<8x128xf32> to vector<8xf32>
    %21 = vector.shape_cast %20 : vector<8xf32> to vector<8x1xf32>
    %22 = tpu.reciprocal %21 {approx = true} : vector<8x1xf32> -> vector<8x1xf32>
    %23 = vector.broadcast %22 : vector<8x1xf32> to vector<8x128xf32>
    %24 = arith.mulf %19, %23 : vector<8x128xf32>
    %25 = arith.truncf %24 : vector<8x128xf32> to vector<8x128xbf16>
    %c0_13 = arith.constant 0 : index
    %c0_14 = arith.constant 0 : index
    %26 = vector.load %arg6[%c0_13, %c0_14] : memref<8x128xbf16, #tpu.memory_space<vmem>>, vector<8x128xbf16>
    tpu.vector_store %arg6[%c0_13, %c0_14], %25 {strides = array<i32>} : memref<8x128xbf16, #tpu.memory_space<vmem>>, vector<8x128xbf16>,
    return
  }
  func.func @transform_0(%arg0: i32) -> (i32, i32) {
    %c0_i32 = arith.constant 0 : i32
    %c0_i32_0 = arith.constant 0 : i32
    return %arg0, %c0_i32 : i32, i32
  }
  func.func @transform_1(%arg0: i32) -> (i32, i32) {
    %c0_i32 = arith.constant 0 : i32
    %c0_i32_0 = arith.constant 0 : i32
    %c0_i32_1 = arith.constant 0 : i32
    return %c0_i32, %c0_i32_0 : i32, i32
  }
  func.func @transform_2(%arg0: i32) -> (i32, i32) {
    %c0_i32 = arith.constant 0 : i32
    %c0_i32_0 = arith.constant 0 : i32
    %c0_i32_1 = arith.constant 0 : i32
    return %c0_i32, %c0_i32_0 : i32, i32
  }
  func.func @transform_3(%arg0: i32) -> (i32, i32) {
    %c0_i32 = arith.constant 0 : i32
    %c0_i32_0 = arith.constant 0 : i32
    %c0_i32_1 = arith.constant 0 : i32
    return %c0_i32, %c0_i32_0 : i32, i32
  }
  func.func @transform_4(%arg0: i32) -> (i32, i32) {
    %c0_i32 = arith.constant 0 : i32
    %c0_i32_0 = arith.constant 0 : i32
    %c0_i32_1 = arith.constant 0 : i32
    return %c0_i32, %c0_i32_0 : i32, i32
  }
  func.func @transform_5(%arg0: i32) -> (i32, i32) {
    %c0_i32 = arith.constant 0 : i32
    %c0_i32_0 = arith.constant 0 : i32
    return %arg0, %c0_i32 : i32, i32
  }
}

</mosaic_0001>

<bundles_post_ra>
// kernel: tpu_custom_call.1
= control target key start
LH: loop header
LB: loop body
LE: loop exit
PB: predicated region body
PF: predicated region fallthrough
CT: control target
= control target key end

     0   :  { %10 = vsyncpa [#allocation3], 0  ;;  %s1313_s0 = inlined_call_operand.hbm [shape: f32[8,1024], index: 0, kind: input, shape index: {}]   ;;  %s1314_s1 = inlined_call_operand.hbm [shape: bf16[1024,128], index: 1, kind: input, shape index: {}]   ;;  %s1315_s2 = inlined_call_operand.vmem [shape: f32[1,128], index: 2, kind: input, shape index: {}]   ;;  %s1316_s3 = inlined_call_operand.hbm [shape: bf16[128,128], index: 3, kind: input, shape index: {}]   ;;  %s1317_s4 = inlined_call_operand.vmem [shape: f32[1,128], index: 4, kind: input, shape index: {}]   ;;  %s1318_s5 = inlined_call_operand.hbm [shape: bf16[8,128], index: 5, kind: output, shape index: {}]  }
   0x1   :  { %11 = vsyncpa [#allocation6], 0 }
   0x2   :  { %12 = vsyncpa [#allocation4], 0  ;;  %s1257_s18 = smov [#allocation5]  }
   0x3   :  { %s28_s19 = sshll.u32 %s1257_s18, 4  ;;  %s29_s19 = int_to_ptr.vmem [resolvable:$true] %s28_s19 }
   0x4   :  { %s1179_s20 = scalar_lea.vmem %s29_s19, 8192  ;;  %p1184_p1 = scmp.lt.s32.totalorder %s29_s19, %s29_s19 }
   0x5   :  { %p1180_p0 = scmp.ne.s32.totalorder %s29_s19, %s1179_s20  ;;  %p1185_p2 = scmp.lt.s32.totalorder %s1179_s20, %s1179_s20 }
   0x7   :  { %p1186_p3 = por %p1185_p2, %p1184_p1 }
   0x9   :  { %p1187_p4 = pnand %p1186_p3, %p1180_p0 }
   0xb   :  { %1190 = shalt.err (!%p1187_p4)
}
   0xc   :  { %s1258_s21 = smov 64   ;;  %s1259_s22 = smov 4  }
   0xd   :  { %34 = dma.hbm_to_vmem [thread:$0]  %s1314_s1, 8192, %s29_s19, [#allocation6], %s1258_s21, %s1258_s21, %s1259_s22  }
   0xe   :  { %s1260_s25 = smov [#allocation2]   ;;  %s1261_s27 = smov [#allocation7]  }
   0xf   :  { %s19_s26 = sshll.u32 %s1260_s25, 4  ;;  %s42_s28 = sshll.u32 %s1261_s27, 4  ;;  %s20_s26 = int_to_ptr.vmem [resolvable:$true] %s19_s26  ;;  %s43_s28 = int_to_ptr.vmem [resolvable:$true] %s42_s28 }
  0x10   :  { %s1199_s29 = scalar_lea.vmem %s20_s26, 1024  ;;  %p1204_p6 = scmp.lt.s32.totalorder %s20_s26, %s20_s26 }
  0x11   :  { %p1200_p5 = scmp.ne.s32.totalorder %s20_s26, %s1199_s29  ;;  %p1205_p7 = scmp.lt.s32.totalorder %s1199_s29, %s1199_s29 }
  0x13   :  { %p1206_p8 = por %p1205_p7, %p1204_p6 }
  0x15   :  { %p1207_p9 = pnand %p1206_p8, %p1200_p5 }
  0x17   :  { %1210 = shalt.err (!%p1207_p9)
}
  0x18   :  { %22 = dma.hbm_to_vmem [thread:$0]  %s1313_s0, 1024, %s20_s26, [#allocation3]  }
  0x19   :  { %s1219_s7 = scalar_lea.vmem %s43_s28, 1024  ;;  %p1224_p11 = scmp.lt.s32.totalorder %s43_s28, %s43_s28 }
  0x1a   :  { %p1220_p10 = scmp.ne.s32.totalorder %s43_s28, %s1219_s7  ;;  %p1225_p12 = scmp.lt.s32.totalorder %s1219_s7, %s1219_s7 }
  0x1c   :  { %p1226_p13 = por %p1225_p12, %p1224_p11 }
  0x1e   :  { %p1227_p0 = pnand %p1226_p13, %p1220_p10 }
  0x20   :  { %1230 = shalt.err (!%p1227_p0)
}
  0x21   :  { %48 = dma.hbm_to_vmem [thread:$0]  %s1316_s3, 1024, %s43_s28, [#allocation6], %s1258_s21, %s1258_s21, %s1259_s22  }
  0x22   :  { %1251 = dma.done.wait [#allocation3], 1024  }
  0x23   :  { %1252 = vsyncadd [#allocation3], 4294966272 }
  0x24   :  { %1253 = dma.done.wait [#allocation6], 9216  }
  0x25   :  { %1254 = vsyncadd [#allocation6], 4294958080  ;;  %v1095_v0 = vld [vmem:[#allocation5 + $0x78] sm:$0xff]   ;;  %v1099_v4 = vld [vmem:[#allocation5 + $0x70] sm:$0xff]   ;;  %vm1263_vm0 = vmmov 0   ;;  %s1264_s10 = smov [#allocation8]  }
  0x26   :  { %v1096_v1 = vld [vmem:[#allocation5 + $0xf8] sm:$0xff]   ;;  %970 = vmatprep.subr.bf16.mxu0 %v1095_v0  ;;  %v1100_v5 = vld [vmem:[#allocation5 + $0xf0] sm:$0xff]   ;;  %v1103_v8 = vld [vmem:[#allocation5 + $0x68] sm:$0xff]   ;;  %s886_s11 = sshll.u32 %s1264_s10, 4  ;;  %s887_s11 = int_to_ptr.vmem [resolvable:$true] %s886_s11 }
  0x27   :  { %v1097_v2 = vld [vmem:[#allocation5 + $0x38] sm:$0xff]   ;;  %992 = vmatprep.subr.bf16.mxu1 %v1096_v1  ;;  %v1101_v6 = vld [vmem:[#allocation5 + $0x30] sm:$0xff]   ;;  %v1104_v9 = vld [vmem:[#allocation5 + $0xe8] sm:$0xff]   ;;  %p1236_p2 = scmp.lt.s32.totalorder %s887_s11, %s887_s11 }
  0x28   :  { %v1098_v3 = vld [vmem:[#allocation5 + $0xb8] sm:$0xff]   ;;  %971 = vmatpush3.bf16.msra.mxu0 %v1097_v2  ;;  %v1102_v7 = vld [vmem:[#allocation5 + $0xb0] sm:$0xff]   ;;  %v1105_v10 = vld [vmem:[#allocation5 + $0x28] sm:$0xff]  }
  0x29   :  { %993 = vmatpush3.bf16.msra.mxu1 %v1098_v3  ;;  %972 = vmatprep.subr.bf16.mxu0 %v1099_v4  ;;  %v1106_v11 = vld [vmem:[#allocation5 + $0xa8] sm:$0xff]   ;;  %v1107_v12 = vld [vmem:[#allocation5 + $0x60] sm:$0xff]   ;;  %v1111_v16 = vld [vmem:[#allocation5 + $0x58] sm:$0xff]  }
  0x2a   :  { %994 = vmatprep.subr.bf16.mxu1 %v1100_v5  ;;  %v1108_v13 = vld [vmem:[#allocation5 + $0xe0] sm:$0xff]   ;;  %v1112_v17 = vld [vmem:[#allocation5 + $0xd8] sm:$0xff]   ;;  %v1115_v20 = vld [vmem:[#allocation5 + $0x50] sm:$0xff]  }
  0x2b   :  { %v1109_v14 = vld [vmem:[#allocation5 + $0x20] sm:$0xff]   ;;  %v1113_v18 = vld [vmem:[#allocation5 + $0x18] sm:$0xff]   ;;  %v1116_v21 = vld [vmem:[#allocation5 + $0xd0] sm:$0xff]  }
  0x2c   :  { %973 = vmatpush3.bf16.msra.mxu0 %v1101_v6  ;;  %v1110_v15 = vld [vmem:[#allocation5 + $0xa0] sm:$0xff]   ;;  %v1114_v19 = vld [vmem:[#allocation5 + $0x98] sm:$0xff]   ;;  %v1117_v22 = vld [vmem:[#allocation5 + $0x10] sm:$0xff]  }
  0x2d   :  { %995 = vmatpush3.bf16.msra.mxu1 %v1102_v7  ;;  %974 = vmatprep.subr.bf16.mxu0 %v1103_v8  ;;  %v1118_v23 = vld [vmem:[#allocation5 + $0x90] sm:$0xff]   ;;  %v1119_v24 = vld [vmem:[#allocation5 + $0x48] sm:$0xff]   ;;  %v1123_v28 = vld [vmem:[#allocation5 + $0x40] sm:$0xff]  }
  0x2e   :  { %996 = vmatprep.subr.bf16.mxu1 %v1104_v9  ;;  %v1120_v25 = vld [vmem:[#allocation5 + $0xc8] sm:$0xff]   ;;  %v1124_v29 = vld [vmem:[#allocation5 + $0xc0] sm:$0xff]   ;;  %v64_v33 = vld [vmem:[#allocation2 + $0x18] sm:$0xff] }
  0x2f   :  { %v1121_v26 = vld [vmem:[#allocation5 + $0x8] sm:$0xff]   ;;  %v1125_v30 = vld [vmem:[#allocation5] sm:$0xff]   ;;  %v72_v36 = vpack.c.bf16 %v64_v33, %v64_v33  ;;  %v63_v38 = vld [vmem:[#allocation2 + $0x10] sm:$0xff] }
  0x30   :  { %975 = vmatpush3.bf16.msra.mxu0 %v1105_v10  ;;  %v1122_v27 = vld [vmem:[#allocation5 + $0x88] sm:$0xff]   ;;  %v1126_v31 = vld [vmem:[#allocation5 + $0x80] sm:$0xff]   ;;  %v71_v39 = vpack.c.bf16 %v63_v38, %v63_v38  ;;  %v1127_v40 = vld [vmem:[#allocation5 + $0x178] sm:$0xff]  }
  0x31   :  { %997 = vmatpush3.bf16.msra.mxu1 %v1106_v11  ;;  %976 = vmatprep.subr.bf16.mxu0 %v1107_v12  ;;  %v62_v32 = vld [vmem:[#allocation2 + $0x8] sm:$0xff]  ;;  %v61_v34 = vld [vmem:[#allocation2] sm:$0xff]  ;;  %v1128_v41 = vld [vmem:[#allocation5 + $0x1f8] sm:$0xff]  }
  0x32   :  { %998 = vmatprep.subr.bf16.mxu1 %v1108_v13  ;;  %v70_v35 = vpack.c.bf16 %v62_v32, %v62_v32  ;;  %v69_v37 = vpack.c.bf16 %v61_v34, %v61_v34  ;;  %668 = vmatprep.mubr.bf16.mxu1 %v72_v36  ;;  %v1129_v42 = vld [vmem:[#allocation5 + $0x138] sm:$0xff]   ;;  %v1131_v44 = vld [vmem:[#allocation5 + $0x170] sm:$0xff]   ;;  %v1135_v48 = vld [vmem:[#allocation5 + $0x168] sm:$0xff]  }
  0x33   :  { %v1130_v43 = vld [vmem:[#allocation5 + $0x1b8] sm:$0xff]   ;;  %v1132_v45 = vld [vmem:[#allocation5 + $0x1f0] sm:$0xff]   ;;  %v1136_v49 = vld [vmem:[#allocation5 + $0x1e8] sm:$0xff]  }
  0x34   :  { %977 = vmatpush3.bf16.msra.mxu0 %v1109_v14  ;;  %628 = vmatprep.mubr.bf16.mxu0 %v70_v35  ;;  %v1133_v46 = vld [vmem:[#allocation5 + $0x130] sm:$0xff]   ;;  %v1137_v50 = vld [vmem:[#allocation5 + $0x128] sm:$0xff]   ;;  %v1139_v52 = vld [vmem:[#allocation5 + $0x160] sm:$0xff]  }
  0x35   :  { %999 = vmatpush3.bf16.msra.mxu1 %v1110_v15  ;;  %978 = vmatprep.subr.bf16.mxu0 %v1111_v16  ;;  %v1134_v47 = vld [vmem:[#allocation5 + $0x1b0] sm:$0xff]   ;;  %v1138_v51 = vld [vmem:[#allocation5 + $0x1a8] sm:$0xff]   ;;  %v1140_v53 = vld [vmem:[#allocation5 + $0x1e0] sm:$0xff]  }
  0x36   :  { %1000 = vmatprep.subr.bf16.mxu1 %v1112_v17  ;;  %v1141_v54 = vld [vmem:[#allocation5 + $0x120] sm:$0xff]   ;;  %v1143_v56 = vld [vmem:[#allocation5 + $0x158] sm:$0xff]   ;;  %v1147_v60 = vld [vmem:[#allocation5 + $0x150] sm:$0xff]   ;;  %v1262_v17 = vmov 0.0  }
  0x37   :  { %v1142_v55 = vld [vmem:[#allocation5 + $0x1a0] sm:$0xff]   ;;  %v1144_v57 = vld [vmem:[#allocation5 + $0x1d8] sm:$0xff]   ;;  %v1148_v61 = vld [vmem:[#allocation5 + $0x1d0] sm:$0xff]  }
  0x38   :  { %979 = vmatpush3.bf16.msra.mxu0 %v1113_v18  ;;  %v1145_v58 = vld [vmem:[#allocation5 + $0x118] sm:$0xff]   ;;  %v1149_v62 = vld [vmem:[#allocation5 + $0x110] sm:$0xff]   ;;  %v1151_v0 = vld [vmem:[#allocation5 + $0x148] sm:$0xff]  }
  0x39   :  { %1001 = vmatpush3.bf16.msra.mxu1 %v1114_v19  ;;  %980 = vmatprep.subr.bf16.mxu0 %v1115_v20  ;;  %v1146_v59 = vld [vmem:[#allocation5 + $0x198] sm:$0xff]   ;;  %v1150_v63 = vld [vmem:[#allocation5 + $0x190] sm:$0xff]   ;;  %v1152_v1 = vld [vmem:[#allocation5 + $0x1c8] sm:$0xff]  }
  0x3a   :  { %1002 = vmatprep.subr.bf16.mxu1 %v1116_v21  ;;  %v1153_v2 = vld [vmem:[#allocation5 + $0x108] sm:$0xff]   ;;  %v1155_v4 = vld [vmem:[#allocation5 + $0x140] sm:$0xff]   ;;  %v68_v9 = vld [vmem:[#allocation2 + $0x38] sm:$0xff] }
  0x3b   :  { %v1154_v3 = vld [vmem:[#allocation5 + $0x188] sm:$0xff]   ;;  %v1156_v5 = vld [vmem:[#allocation5 + $0x1c0] sm:$0xff]   ;;  %v76_v11 = vpack.c.bf16 %v68_v9, %v68_v9  ;;  %v67_v13 = vld [vmem:[#allocation2 + $0x30] sm:$0xff] }
  0x3c   :  { %981 = vmatpush3.bf16.msra.mxu0 %v1117_v22  ;;  %v1157_v6 = vld [vmem:[#allocation5 + $0x100] sm:$0xff]   ;;  %v66_v8 = vld [vmem:[#allocation2 + $0x28] sm:$0xff]  ;;  %v75_v15 = vpack.c.bf16 %v67_v13, %v67_v13  ;;  %v1159_v16 = vld [vmem:[#allocation7 + $0x38] sm:$0xff]  }
  0x3d   :  { %1003 = vmatpush3.bf16.msra.mxu1 %v1118_v23  ;;  %982 = vmatprep.subr.bf16.mxu0 %v1119_v24  ;;  %v1158_v7 = vld [vmem:[#allocation5 + $0x180] sm:$0xff]   ;;  %v74_v10 = vpack.c.bf16 %v66_v8, %v66_v8  ;;  %v1160_v18 = vld [vmem:[#allocation7 + $0x30] sm:$0xff]   ;;  %v1161_v19 = vld [vmem:[#allocation7 + $0x28] sm:$0xff]  }
  0x3e   :  { %1004 = vmatprep.subr.bf16.mxu1 %v1120_v25  ;;  %v65_v12 = vld [vmem:[#allocation2 + $0x20] sm:$0xff]  ;;  %v1163_v21 = vld [vmem:[#allocation7 + $0x18] sm:$0xff]   ;;  %v1164_v22 = vld [vmem:[#allocation7 + $0x10] sm:$0xff]  }
  0x3f   :  { %v73_v14 = vpack.c.bf16 %v65_v12, %v65_v12  ;;  %v1162_v20 = vld [vmem:[#allocation7 + $0x20] sm:$0xff]   ;;  %v1165_v23 = vld [vmem:[#allocation7 + $0x8] sm:$0xff]  }
  0x40   :  { %983 = vmatpush3.bf16.msra.mxu0 %v1121_v26  ;;  %v1166_v24 = vld [vmem:[#allocation7] sm:$0xff]  }
  0x41   :  { %1005 = vmatpush3.bf16.msra.mxu1 %v1122_v27  ;;  %984 = vmatprep.subr.bf16.mxu0 %v1123_v28  ;;  %v896_v34 = vld [vmem:[%s1315_s2] ss:$0 sm:$0xff] }
  0x42   :  { %1006 = vmatprep.subr.bf16.mxu1 %v1124_v29 }
  0x44   :  { %985 = vmatpush3.bf16.msra.mxu0 %v1125_v30 }
  0x45   :  { %1007 = vmatpush3.bf16.msra.mxu1 %v1126_v31  ;;  %1014 = vmatprep.subr.bf16.mxu0 %v1127_v40 }
  0x46   :  { %1036 = vmatprep.subr.bf16.mxu1 %v1128_v41 }
  0x47   :  { %629 = vmatmul.mubr.bf16.vlgmr.msra.gmra.mxu0 %v69_v37 }
  0x48   :  { %669 = vmatmul.mubr.bf16.vlgmr.msra.gmra.mxu1 %v71_v39  ;;  %1015 = vmatpush3.bf16.msra.mxu0 %v1129_v42 }
  0x49   :  { %1037 = vmatpush3.bf16.msra.mxu1 %v1130_v43  ;;  %1016 = vmatprep.subr.bf16.mxu0 %v1131_v44 }
  0x4a   :  { %1038 = vmatprep.subr.bf16.mxu1 %v1132_v45  ;;  %708 = vmatprep.mubr.bf16.mxu0 %v74_v10 }
  0x4b   :  { %748 = vmatprep.mubr.bf16.mxu1 %v76_v11 }
  0x4c   :  { %1017 = vmatpush3.bf16.msra.mxu0 %v1133_v46 }
  0x4d   :  { %1039 = vmatpush3.bf16.msra.mxu1 %v1134_v47  ;;  %1018 = vmatprep.subr.bf16.mxu0 %v1135_v48 }
  0x4e   :  { %1040 = vmatprep.subr.bf16.mxu1 %v1136_v49 }
  0x50   :  { %1019 = vmatpush3.bf16.msra.mxu0 %v1137_v50 }
  0x51   :  { %1041 = vmatpush3.bf16.msra.mxu1 %v1138_v51  ;;  %1020 = vmatprep.subr.bf16.mxu0 %v1139_v52  ;;  %v961_v52 = vld [vmem:[%s1317_s4] ss:$0 sm:$0xff]  ;;  %s1231_s4 = scalar_lea.vmem %s887_s11, 64 }
  0x52   :  { %1042 = vmatprep.subr.bf16.mxu1 %v1140_v53  ;;  %p1232_p1 = scmp.ne.s32.totalorder %s887_s11, %s1231_s4  ;;  %p1237_p3 = scmp.lt.s32.totalorder %s1231_s4, %s1231_s4 }
  0x54   :  { %1021 = vmatpush3.bf16.msra.mxu0 %v1141_v54  ;;  %p1238_p4 = por %p1237_p3, %p1236_p2 }
  0x55   :  { %1043 = vmatpush3.bf16.msra.mxu1 %v1142_v55  ;;  %1022 = vmatprep.subr.bf16.mxu0 %v1143_v56 }
  0x56   :  { %1044 = vmatprep.subr.bf16.mxu1 %v1144_v57  ;;  %p1239_p5 = pnand %p1238_p4, %p1232_p1 }
  0x58   :  { %1023 = vmatpush3.bf16.msra.mxu0 %v1145_v58 }
  0x59   :  { %1045 = vmatpush3.bf16.msra.mxu1 %v1146_v59  ;;  %1024 = vmatprep.subr.bf16.mxu0 %v1147_v60 }
  0x5a   :  { %1046 = vmatprep.subr.bf16.mxu1 %v1148_v61 }
  0x5c   :  { %1025 = vmatpush3.bf16.msra.mxu0 %v1149_v62 }
  0x5d   :  { %1047 = vmatpush3.bf16.msra.mxu1 %v1150_v63  ;;  %1026 = vmatprep.subr.bf16.mxu0 %v1151_v0 }
  0x5e   :  { %1048 = vmatprep.subr.bf16.mxu1 %v1152_v1 }
  0x60   :  { %1027 = vmatpush3.bf16.msra.mxu0 %v1153_v2 }
  0x61   :  { %1049 = vmatpush3.bf16.msra.mxu1 %v1154_v3  ;;  %1028 = vmatprep.subr.bf16.mxu0 %v1155_v4 }
  0x62   :  { %1050 = vmatprep.subr.bf16.mxu1 %v1156_v5 }
  0x64   :  { %1029 = vmatpush3.bf16.msra.mxu0 %v1157_v6 }
  0x65   :  { %1051 = vmatpush3.bf16.msra.mxu1 %v1158_v7  ;;  %1067 = vmatprep.subr.bf16.mxu0 %v1262_v17 }
  0x67   :  { %709 = vmatmul.mubr.bf16.vlgmr.msra.gmra.mxu0 %v73_v14 }
  0x68   :  { %749 = vmatmul.mubr.bf16.vlgmr.msra.gmra.mxu1 %v75_v15  ;;  %1068 = vmatpush3.bf16.msra.mxu0 %v1159_v16 }
  0x69   :  { %1069 = vmatprep.subr.bf16.mxu0 %v1262_v17  ;;  %1083 = vmatprep.mubr.msk.bf16.mxu0 %vm1263_vm0, %v1262_v17 }
  0x6c   :  { %1070 = vmatpush3.bf16.msra.mxu0 %v1160_v18 }
  0x6d   :  { %1071 = vmatprep.subr.bf16.mxu0 %v1262_v17 }
  0x70   :  { %1072 = vmatpush3.bf16.msra.mxu0 %v1161_v19 }
  0x71   :  { %1073 = vmatprep.subr.bf16.mxu0 %v1262_v17 }
  0x74   :  { %1074 = vmatpush3.bf16.msra.mxu0 %v1162_v20 }
  0x75   :  { %1075 = vmatprep.subr.bf16.mxu0 %v1262_v17 }
  0x78   :  { %1076 = vmatpush3.bf16.msra.mxu0 %v1163_v21 }
  0x79   :  { %1077 = vmatprep.subr.bf16.mxu0 %v1262_v17 }
  0x7c   :  { %1078 = vmatpush3.bf16.msra.mxu0 %v1164_v22 }
  0x7d   :  { %1079 = vmatprep.subr.bf16.mxu0 %v1262_v17 }
  0x80   :  { %1080 = vmatpush3.bf16.msra.mxu0 %v1165_v23 }
  0x81   :  { %1081 = vmatprep.subr.bf16.mxu0 %v1262_v17 }
  0x84   :  { %1082 = vmatpush3.bf16.msra.mxu0 %v1166_v24 }
 0x107   :  { %v986_v25 = vpop.f32.mrf.mxu0 }
 0x108   :  { %v1008_v26 = vpop.f32.mrf.mxu1 }
 0x109   :  { %v987_v27 = vpop.f32.mrf.mxu0 }
 0x10a   :  { %v1009_v28 = vpop.f32.mrf.mxu1  ;;  %v988_v33 = vadd.f32 %v987_v27, %v986_v25 }
 0x10b   :  { %v989_v29 = vpop.f32.mrf.mxu0  ;;  %v1010_v36 = vadd.f32 %v1009_v28, %v1008_v26 }
 0x10c   :  { %v1011_v30 = vpop.f32.mrf.mxu1  ;;  %v631_v35 = vadd.f32 %v988_v33, %v896_v34 }
 0x10d   :  { %v990_v31 = vpop.f32.mrf.mxu0 }
 0x10e   :  { %v1012_v32 = vpop.f32.mrf.mxu1  ;;  %v671_v40 = vadd.f32 %v1010_v36, %v631_v35 }
 0x127   :  { %v1030_v37 = vpop.f32.mrf.mxu0 }
 0x128   :  { %v1052_v38 = vpop.f32.mrf.mxu1 }
 0x129   :  { %v1031_v39 = vpop.f32.mrf.mxu0 }
 0x12a   :  { %v1032_v41 = vadd.f32 %v1031_v39, %v1030_v37  ;;  %v1053_v42 = vpop.f32.mrf.mxu1 }
 0x12b   :  { %v1033_v43 = vpop.f32.mrf.mxu0  ;;  %v1054_v45 = vadd.f32 %v1053_v42, %v1052_v38 }
 0x12c   :  { %v711_v44 = vadd.f32 %v1032_v41, %v671_v40  ;;  %v1055_v46 = vpop.f32.mrf.mxu1 }
 0x12d   :  { %v1034_v47 = vpop.f32.mrf.mxu0 }
 0x12e   :  { %v751_v48 = vadd.f32 %v1054_v45, %v711_v44  ;;  %v1056_v49 = vpop.f32.mrf.mxu1 }
 0x130   :  { %v756_v50 = vmax.f32 %v751_v48, 0.0 }
 0x132   :  { %v757_v51 = vpack.c.bf16 %v756_v50, %v756_v50 }
 0x134   :  { %1084 = vmatmul.mubr.bf16.vlgmr.msra.gmra.mxu0 %v757_v51 }
 0x1f4   :  { %v863_v53 = vpop.f32.mrf.mxu0 }
 0x1f5   :  { %v864_v54 = vadd.f32 %v961_v52, %v863_v53 }
 0x1f6   :  { %v1085_v55 = vpop.f32.mrf.mxu0 }
 0x1f7   :  { %869 = vmax.xlane.f32.xlu0 %v864_v54 }
 0x1f8   :  { %v866_v56 = vpop.f32.mrf.mxu0 }
 0x1fa   :  { %v1086_v57 = vpop.f32.mrf.mxu0 }
 0x280   :  { %v870_v58 = vpop.xlane.xlu0 %869 }
 0x281   :  { %v871_v59 = vsub.f32 %v864_v54, %v870_v58 }
 0x283   :  { %v872_v60 = vmul.f32 1.442695, %v871_v59 }
 0x285   :  { %1167 = vpow2.f32 %v872_v60 }
 0x292   :  { %v1168_v61 = vpop.eup %1167 }
 0x293   :  { %874 = vadd.xlane.f32.xlu0 %v1168_v61 }
 0x31c   :  { %v875_v62 = vpop.xlane.xlu0 %874 }
 0x31d   :  { %1169 = vrcp.f32 %v875_v62 }
 0x32a   :  { %v1170_v63 = vpop.eup %1169 }
 0x32b   :  { %v877_v0 = vmul.f32 %v1170_v63, %v1168_v61 }
 0x32d   :  { %v878_v1 = vpack.c.bf16 %v877_v0, %v877_v0 }
 0x32f   :  { %879 = vst [vmem:[#allocation8] sm:$0xf] %v878_v1 }
 0x330   :  { %1242 = shalt.err (!%p1239_p5)
}
 0x331   :  { %889 = dma.vmem_to_hbm [thread:$0]  %s887_s11, 64, %s1318_s5, [#allocation4]  }
 0x332   :  { %1255 = dma.done.wait [#allocation4], 64  }
 0x333   :  { %1256 = vsyncadd [#allocation4], 4294967232 }
 0x334   :  { %893 = vsyncpa [#allocation3], 1 }
 0x335   :  { %894 = vsyncpa [#allocation6], 1 }
 0x336   :  { %895 = vsyncpa [#allocation4], 1 }

</bundles_post_ra>
